<compile_context>
chip_gen: v7x
topology: tpu7x:2x2x1
jax: 0.10.0
libtpu: 0.0.40
codegen_flags: <defaults>
</compile_context>

<pallas_src>
import jax
import jax.numpy as jnp
from jax.experimental import pallas as pl
from jax.experimental.pallas import tpu as pltpu


def supernet_kernel(pscale_ref, flag_ref,        # SMEM scalars
                    x_ref, p_ref,                # batched activations (TB,D)/(TB,P)
                    w1p_ref, w1x_ref,            # input_fc split: (P,H) / (D,H)
                    w2_ref, w3_ref, wo_ref,      # hidden / output weights
                    b1_ref, b2_ref, b3_ref, bo_ref,   # biases (1,H)/(1,H)/(1,H)/(1,D)
                    out_ref):
    P = w1p_ref.shape[0]
    flag = flag_ref[0]          # 1 -> all(p == 0): identity path

    @pl.when(flag != 0)
    def _identity_path():
        out_ref[...] = x_ref[...]

    @pl.when(flag == 0)
    def _mlp_path():
        x = x_ref[...]                      # (TB, D)
        p = p_ref[...]                      # (TB, P)
        scale = pscale_ref[0]               # scalar (SMEM)

        # input_fc on the (virtually) concatenated [p * scale, x]
        h = jnp.dot(x, w1x_ref[...], preferred_element_type=jnp.float32)
        h = h + b1_ref[...]
        if P <= 8:
            # tiny contraction -> unrolled VPU broadcast-FMAs (skip the MXU)
            for k in range(P):
                h = h + (p[:, k:k + 1] * scale) * w1p_ref[k:k + 1, :]
        else:
            h = h + jnp.dot(p * scale, w1p_ref[...],
                            preferred_element_type=jnp.float32)
        h = jnp.maximum(h, 0.0)

        # hidden layer 1
        h = jnp.dot(h, w2_ref[...], preferred_element_type=jnp.float32)
        h = jnp.maximum(h + b2_ref[...], 0.0)

        # hidden layer 2
        h = jnp.dot(h, w3_ref[...], preferred_element_type=jnp.float32)
        h = jnp.maximum(h + b3_ref[...], 0.0)

        # output_fc
        out = jnp.dot(h, wo_ref[...], preferred_element_type=jnp.float32)
        out = out + bo_ref[...]
        out_ref[...] = out.astype(out_ref.dtype)


def supernet_forward(x, p, params, *, tb=None):
    B, D = x.shape
    _, P = p.shape

    if tb is None:
        tb = B if B <= 128 else 128
    assert B % tb == 0 and (tb == B or tb % 8 == 0), "tb must divide B; multiple of 8"

    # Global (whole-tensor) zero check, exactly matching torch.all(p == 0).
    flag = jnp.all(p == 0.0).astype(jnp.int32).reshape(1,)

    smem = pl.BlockSpec(memory_space=pltpu.MemorySpace.SMEM)
    resident = lambda a: pl.BlockSpec(a.shape, lambda i: (0, 0))
    batched = lambda cols: pl.BlockSpec((tb, cols), lambda i: (i, 0))

    args = (params["p_scale"], flag,
            x, p,
            params["w1p"], params["w1x"],
            params["w2"], params["w3"], params["wo"],
            params["b1"], params["b2"], params["b3"], params["bo"])

    in_specs = [
        smem, smem,
        batched(D), batched(P),
        resident(params["w1p"]), resident(params["w1x"]),
        resident(params["w2"]), resident(params["w3"]), resident(params["wo"]),
        resident(params["b1"]), resident(params["b2"]),
        resident(params["b3"]), resident(params["bo"]),
    ]

    return pl.pallas_call(
        supernet_kernel,
        out_shape=jax.ShapeDtypeStruct((B, D), x.dtype),
        grid=(B // tb,),
        in_specs=in_specs,
        out_specs=batched(D),
        compiler_params=pltpu.CompilerParams(
            dimension_semantics=("parallel",)),
    )(*args)


def init_params(key, descriptor_dim, parameter_dim, hidden_dim):
    D, P, H = descriptor_dim, parameter_dim, hidden_dim
    keys = jax.random.split(key, 8)
    s = 0.05
    # input_fc weight stored as (in = P + D, out = H); torch's cat([scaled_p, x])
    # maps the first P input rows to p and the next D rows to x.
    w1 = jax.random.normal(keys[0], (P + D, H), jnp.float32) * s
    b1 = jax.random.normal(keys[1], (H,), jnp.float32) * s
    w2 = jax.random.normal(keys[2], (H, H), jnp.float32) * s
    b2 = jax.random.normal(keys[3], (H,), jnp.float32) * s
    w3 = jax.random.normal(keys[4], (H, H), jnp.float32) * s
    b3 = jax.random.normal(keys[5], (H,), jnp.float32) * s
    wo = jax.random.normal(keys[6], (H, D), jnp.float32) * s
    bo = jax.random.normal(keys[7], (D,), jnp.float32) * s

    return {
        "p_scale": jnp.ones((1,), jnp.float32),
        "w1p": w1[:P, :], "w1x": w1[P:, :],
        "w2": w2, "w3": w3, "wo": wo,
        "b1": b1.reshape(1, H), "b2": b2.reshape(1, H),
        "b3": b3.reshape(1, H), "bo": bo.reshape(1, D),
    }


def supernet_ref(x, p, params):
    """Pure-JAX reference for correctness."""
    scaled_p = p * params["p_scale"][0]
    combined = jnp.concatenate([scaled_p, x], axis=1)
    w1 = jnp.concatenate([params["w1p"], params["w1x"]], axis=0)
    h = jax.nn.relu(combined @ w1 + params["b1"][0])
    h = jax.nn.relu(h @ params["w2"] + params["b2"][0])
    h = jax.nn.relu(h @ params["w3"] + params["b3"][0])
    residual = h @ params["wo"] + params["bo"][0]
    return jnp.where(jnp.all(p == 0.0), x, residual)


if __name__ == "__main__":
    # Small shapes consistent with the module's forward:
    #   descriptor_dim=32, parameter_dim=3, hidden_dim=32, num_layers=2, batch=32
    B, D, P, H = 32, 32, 3, 32
    TB = 8   # batch tile (f32 sublane multiple); grid = (B // TB,)

    key = jax.random.PRNGKey(0)
    kx, kp, kparams = jax.random.split(key, 3)
    x = jax.random.normal(kx, (B, D), jnp.float32)
    p = jax.random.normal(kp, (B, P), jnp.float32)
    params = init_params(kparams, D, P, H)

    out = jax.block_until_ready(supernet_forward(x, p, params, tb=TB))
    ref = supernet_ref(x, p, params)
    assert out.shape == (B, D) and out.dtype == jnp.float32
    assert jnp.allclose(out, ref, atol=1e-5, rtol=1e-4), "mismatch vs reference"

    # All-zero-p path (must return x unchanged; MLP body is skipped via pl.when).
    p0 = jnp.zeros_like(p)
    out0 = jax.block_until_ready(supernet_forward(x, p0, params, tb=TB))
    assert jnp.allclose(out0, x, atol=1e-6), "all-zero-p path should return x"

    print("KERNEL_OK")
</pallas_src>

<mosaic_0001>
module attributes {stable_mosaic.version = 11 : i64} {
  func.func @supernet_kernel(%arg0: i32, %arg1: memref<1xf32, #tpu.memory_space<smem>>, %arg2: memref<1xi32, #tpu.memory_space<smem>>, %arg3: memref<8x32xf32, #tpu.memory_space<vmem>>, %arg4: memref<8x3xf32, #tpu.memory_space<vmem>>, %arg5: memref<3x32xf32, #tpu.memory_space<vmem>>, %arg6: memref<32x32xf32, #tpu.memory_space<vmem>>, %arg7: memref<32x32xf32, #tpu.memory_space<vmem>>, %arg8: memref<32x32xf32, #tpu.memory_space<vmem>>, %arg9: memref<32x32xf32, #tpu.memory_space<vmem>>, %arg10: memref<1x32xf32, #tpu.memory_space<vmem>>, %arg11: memref<1x32xf32, #tpu.memory_space<vmem>>, %arg12: memref<1x32xf32, #tpu.memory_space<vmem>>, %arg13: memref<1x32xf32, #tpu.memory_space<vmem>>, %arg14: memref<8x32xf32, #tpu.memory_space<vmem>>) attributes {dimension_semantics = [#tpu.dimension_semantics<parallel>], iteration_bounds = array<i64: 4>, scalar_prefetch = 0 : i64, scratch_operands = 0 : i64, tpu.core_type = #tpu.core_type<tc>, window_params = [{transform_indices = @transform_0, window_bounds = array<i64: 1>}, {transform_indices = @transform_1, window_bounds = array<i64: 1>}, {transform_indices = @transform_2, window_bounds = array<i64: 8, 32>}, {transform_indices = @transform_3, window_bounds = array<i64: 8, 3>}, {pipeline_mode = #tpu.pipeline_mode<synchronous>, transform_indices = @transform_4, window_bounds = array<i64: 3, 32>}, {pipeline_mode = #tpu.pipeline_mode<synchronous>, transform_indices = @transform_5, window_bounds = array<i64: 32, 32>}, {pipeline_mode = #tpu.pipeline_mode<synchronous>, transform_indices = @transform_6, window_bounds = array<i64: 32, 32>}, {pipeline_mode = #tpu.pipeline_mode<synchronous>, transform_indices = @transform_7, window_bounds = array<i64: 32, 32>}, {pipeline_mode = #tpu.pipeline_mode<synchronous>, transform_indices = @transform_8, window_bounds = array<i64: 32, 32>}, {pipeline_mode = #tpu.pipeline_mode<synchronous>, transform_indices = @transform_9, window_bounds = array<i64: 1, 32>}, {pipeline_mode = #tpu.pipeline_mode<synchronous>, transform_indices = @transform_10, window_bounds = array<i64: 1, 32>}, {pipeline_mode = #tpu.pipeline_mode<synchronous>, transform_indices = @transform_11, window_bounds = array<i64: 1, 32>}, {pipeline_mode = #tpu.pipeline_mode<synchronous>, transform_indices = @transform_12, window_bounds = array<i64: 1, 32>}, {transform_indices = @transform_13, window_bounds = array<i64: 8, 32>}]} {
    %c0 = arith.constant 0 : index
    %0 = memref.load %arg2[%c0] : memref<1xi32, #tpu.memory_space<smem>>
    %c0_i32 = arith.constant 0 : i32
    %1 = arith.cmpi ne, %0, %c0_i32 : i32
    %2 = arith.extui %1 : i1 to i32
    %c0_i32_0 = arith.constant 0 : i32
    %3 = arith.cmpi ne, %2, %c0_i32_0 : i32
    scf.if %3 {
      %c0_3 = arith.constant 0 : index
      %c0_4 = arith.constant 0 : index
      %7 = vector.load %arg3[%c0_3, %c0_4] : memref<8x32xf32, #tpu.memory_space<vmem>>, vector<8x32xf32>
      %c0_5 = arith.constant 0 : index
      %c0_6 = arith.constant 0 : index
      %8 = vector.load %arg14[%c0_5, %c0_6] : memref<8x32xf32, #tpu.memory_space<vmem>>, vector<8x32xf32>
      tpu.vector_store %arg14[%c0_5, %c0_6], %7 {strides = array<i32>} : memref<8x32xf32, #tpu.memory_space<vmem>>, vector<8x32xf32>,
    } else {
    }
    %c0_i32_1 = arith.constant 0 : i32
    %4 = arith.cmpi eq, %0, %c0_i32_1 : i32
    %5 = arith.extui %4 : i1 to i32
    %c0_i32_2 = arith.constant 0 : i32
    %6 = arith.cmpi ne, %5, %c0_i32_2 : i32
    scf.if %6 {
      %c0_3 = arith.constant 0 : index
      %c0_4 = arith.constant 0 : index
      %7 = vector.load %arg3[%c0_3, %c0_4] : memref<8x32xf32, #tpu.memory_space<vmem>>, vector<8x32xf32>
      %c0_5 = arith.constant 0 : index
      %c0_6 = arith.constant 0 : index
      %8 = vector.load %arg4[%c0_5, %c0_6] : memref<8x3xf32, #tpu.memory_space<vmem>>, vector<8x3xf32>
      %c0_7 = arith.constant 0 : index
      %9 = memref.load %arg1[%c0_7] : memref<1xf32, #tpu.memory_space<smem>>
      %c0_8 = arith.constant 0 : index
      %c0_9 = arith.constant 0 : index
      %10 = vector.load %arg6[%c0_8, %c0_9] : memref<32x32xf32, #tpu.memory_space<vmem>>, vector<32x32xf32>
      %cst = arith.constant dense<0.000000e+00> : vector<8x32xf32>
      %11 = tpu.matmul %7, %10, %cst {dimension_numbers = #tpu.dot_dimension_numbers<[1], [0], [0], [1], [0, 0, 1, 1], [], []>} : vector<8x32xf32>, vector<32x32xf32>, vector<8x32xf32> -> vector<8x32xf32>
      %c0_10 = arith.constant 0 : index
      %c0_11 = arith.constant 0 : index
      %12 = vector.load %arg10[%c0_10, %c0_11] : memref<1x32xf32, #tpu.memory_space<vmem>>, vector<1x32xf32>
      %13 = vector.broadcast %12 : vector<1x32xf32> to vector<8x32xf32>
      %14 = arith.addf %11, %13 : vector<8x32xf32>
      %15 = vector.extract_strided_slice %8 {offsets = [0, 0], sizes = [8, 1], strides = [1, 1]} : vector<8x3xf32> to vector<8x1xf32>
      %16 = vector.broadcast %9 : f32 to vector<8x1xf32>
      %17 = arith.mulf %15, %16 : vector<8x1xf32>
      %c0_12 = arith.constant 0 : index
      %c0_13 = arith.constant 0 : index
      %18 = vector.load %arg5[%c0_12, %c0_13] : memref<3x32xf32, #tpu.memory_space<vmem>>, vector<1x32xf32>
      %19 = vector.broadcast %17 : vector<8x1xf32> to vector<8x32xf32>
      %20 = vector.broadcast %18 : vector<1x32xf32> to vector<8x32xf32>
      %21 = arith.mulf %19, %20 : vector<8x32xf32>
      %22 = arith.addf %14, %21 : vector<8x32xf32>
      %23 = vector.extract_strided_slice %8 {offsets = [0, 1], sizes = [8, 1], strides = [1, 1]} : vector<8x3xf32> to vector<8x1xf32>
      %24 = vector.broadcast %9 : f32 to vector<8x1xf32>
      %25 = arith.mulf %23, %24 : vector<8x1xf32>
      %c1 = arith.constant 1 : index
      %c0_14 = arith.constant 0 : index
      %26 = vector.load %arg5[%c1, %c0_14] : memref<3x32xf32, #tpu.memory_space<vmem>>, vector<1x32xf32>
      %27 = vector.broadcast %25 : vector<8x1xf32> to vector<8x32xf32>
      %28 = vector.broadcast %26 : vector<1x32xf32> to vector<8x32xf32>
      %29 = arith.mulf %27, %28 : vector<8x32xf32>
      %30 = arith.addf %22, %29 : vector<8x32xf32>
      %31 = vector.extract_strided_slice %8 {offsets = [0, 2], sizes = [8, 1], strides = [1, 1]} : vector<8x3xf32> to vector<8x1xf32>
      %32 = vector.broadcast %9 : f32 to vector<8x1xf32>
      %33 = arith.mulf %31, %32 : vector<8x1xf32>
      %c2 = arith.constant 2 : index
      %c0_15 = arith.constant 0 : index
      %34 = vector.load %arg5[%c2, %c0_15] : memref<3x32xf32, #tpu.memory_space<vmem>>, vector<1x32xf32>
      %35 = vector.broadcast %33 : vector<8x1xf32> to vector<8x32xf32>
      %36 = vector.broadcast %34 : vector<1x32xf32> to vector<8x32xf32>
      %37 = arith.mulf %35, %36 : vector<8x32xf32>
      %38 = arith.addf %30, %37 : vector<8x32xf32>
      %cst_16 = arith.constant 0.000000e+00 : f32
      %39 = vector.broadcast %cst_16 : f32 to vector<8x32xf32>
      %40 = arith.maximumf %38, %39 : vector<8x32xf32>
      %c0_17 = arith.constant 0 : index
      %c0_18 = arith.constant 0 : index
      %41 = vector.load %arg7[%c0_17, %c0_18] : memref<32x32xf32, #tpu.memory_space<vmem>>, vector<32x32xf32>
      %cst_19 = arith.constant dense<0.000000e+00> : vector<8x32xf32>
      %42 = tpu.matmul %40, %41, %cst_19 {dimension_numbers = #tpu.dot_dimension_numbers<[1], [0], [0], [1], [0, 0, 1, 1], [], []>} : vector<8x32xf32>, vector<32x32xf32>, vector<8x32xf32> -> vector<8x32xf32>
      %c0_20 = arith.constant 0 : index
      %c0_21 = arith.constant 0 : index
      %43 = vector.load %arg11[%c0_20, %c0_21] : memref<1x32xf32, #tpu.memory_space<vmem>>, vector<1x32xf32>
      %44 = vector.broadcast %43 : vector<1x32xf32> to vector<8x32xf32>
      %45 = arith.addf %42, %44 : vector<8x32xf32>
      %cst_22 = arith.constant 0.000000e+00 : f32
      %46 = vector.broadcast %cst_22 : f32 to vector<8x32xf32>
      %47 = arith.maximumf %45, %46 : vector<8x32xf32>
      %c0_23 = arith.constant 0 : index
      %c0_24 = arith.constant 0 : index
      %48 = vector.load %arg8[%c0_23, %c0_24] : memref<32x32xf32, #tpu.memory_space<vmem>>, vector<32x32xf32>
      %cst_25 = arith.constant dense<0.000000e+00> : vector<8x32xf32>
      %49 = tpu.matmul %47, %48, %cst_25 {dimension_numbers = #tpu.dot_dimension_numbers<[1], [0], [0], [1], [0, 0, 1, 1], [], []>} : vector<8x32xf32>, vector<32x32xf32>, vector<8x32xf32> -> vector<8x32xf32>
      %c0_26 = arith.constant 0 : index
      %c0_27 = arith.constant 0 : index
      %50 = vector.load %arg12[%c0_26, %c0_27] : memref<1x32xf32, #tpu.memory_space<vmem>>, vector<1x32xf32>
      %51 = vector.broadcast %50 : vector<1x32xf32> to vector<8x32xf32>
      %52 = arith.addf %49, %51 : vector<8x32xf32>
      %cst_28 = arith.constant 0.000000e+00 : f32
      %53 = vector.broadcast %cst_28 : f32 to vector<8x32xf32>
      %54 = arith.maximumf %52, %53 : vector<8x32xf32>
      %c0_29 = arith.constant 0 : index
      %c0_30 = arith.constant 0 : index
      %55 = vector.load %arg9[%c0_29, %c0_30] : memref<32x32xf32, #tpu.memory_space<vmem>>, vector<32x32xf32>
      %cst_31 = arith.constant dense<0.000000e+00> : vector<8x32xf32>
      %56 = tpu.matmul %54, %55, %cst_31 {dimension_numbers = #tpu.dot_dimension_numbers<[1], [0], [0], [1], [0, 0, 1, 1], [], []>} : vector<8x32xf32>, vector<32x32xf32>, vector<8x32xf32> -> vector<8x32xf32>
      %c0_32 = arith.constant 0 : index
      %c0_33 = arith.constant 0 : index
      %57 = vector.load %arg13[%c0_32, %c0_33] : memref<1x32xf32, #tpu.memory_space<vmem>>, vector<1x32xf32>
      %58 = vector.broadcast %57 : vector<1x32xf32> to vector<8x32xf32>
      %59 = arith.addf %56, %58 : vector<8x32xf32>
      %c0_34 = arith.constant 0 : index
      %c0_35 = arith.constant 0 : index
      %60 = vector.load %arg14[%c0_34, %c0_35] : memref<8x32xf32, #tpu.memory_space<vmem>>, vector<8x32xf32>
      tpu.vector_store %arg14[%c0_34, %c0_35], %59 {strides = array<i32>} : memref<8x32xf32, #tpu.memory_space<vmem>>, vector<8x32xf32>,
    } else {
    }
    return
  }
  func.func @transform_0(%arg0: i32) -> i32 {
    %c0_i32 = arith.constant 0 : i32
    %c0_i32_0 = arith.constant 0 : i32
    return %c0_i32 : i32
  }
  func.func @transform_1(%arg0: i32) -> i32 {
    %c0_i32 = arith.constant 0 : i32
    %c0_i32_0 = arith.constant 0 : i32
    return %c0_i32 : i32
  }
  func.func @transform_2(%arg0: i32) -> (i32, i32) {
    %c0_i32 = arith.constant 0 : i32
    %c0_i32_0 = arith.constant 0 : i32
    return %arg0, %c0_i32 : i32, i32
  }
  func.func @transform_3(%arg0: i32) -> (i32, i32) {
    %c0_i32 = arith.constant 0 : i32
    %c0_i32_0 = arith.constant 0 : i32
    return %arg0, %c0_i32 : i32, i32
  }
  func.func @transform_4(%arg0: i32) -> (i32, i32) {
    %c0_i32 = arith.constant 0 : i32
    %c0_i32_0 = arith.constant 0 : i32
    %c0_i32_1 = arith.constant 0 : i32
    return %c0_i32, %c0_i32_0 : i32, i32
  }
  func.func @transform_5(%arg0: i32) -> (i32, i32) {
    %c0_i32 = arith.constant 0 : i32
    %c0_i32_0 = arith.constant 0 : i32
    %c0_i32_1 = arith.constant 0 : i32
    return %c0_i32, %c0_i32_0 : i32, i32
  }
  func.func @transform_6(%arg0: i32) -> (i32, i32) {
    %c0_i32 = arith.constant 0 : i32
    %c0_i32_0 = arith.constant 0 : i32
    %c0_i32_1 = arith.constant 0 : i32
    return %c0_i32, %c0_i32_0 : i32, i32
  }
  func.func @transform_7(%arg0: i32) -> (i32, i32) {
    %c0_i32 = arith.constant 0 : i32
    %c0_i32_0 = arith.constant 0 : i32
    %c0_i32_1 = arith.constant 0 : i32
    return %c0_i32, %c0_i32_0 : i32, i32
  }
  func.func @transform_8(%arg0: i32) -> (i32, i32) {
    %c0_i32 = arith.constant 0 : i32
    %c0_i32_0 = arith.constant 0 : i32
    %c0_i32_1 = arith.constant 0 : i32
    return %c0_i32, %c0_i32_0 : i32, i32
  }
  func.func @transform_9(%arg0: i32) -> (i32, i32) {
    %c0_i32 = arith.constant 0 : i32
    %c0_i32_0 = arith.constant 0 : i32
    %c0_i32_1 = arith.constant 0 : i32
    return %c0_i32, %c0_i32_0 : i32, i32
  }
  func.func @transform_10(%arg0: i32) -> (i32, i32) {
    %c0_i32 = arith.constant 0 : i32
    %c0_i32_0 = arith.constant 0 : i32
    %c0_i32_1 = arith.constant 0 : i32
    return %c0_i32, %c0_i32_0 : i32, i32
  }
  func.func @transform_11(%arg0: i32) -> (i32, i32) {
    %c0_i32 = arith.constant 0 : i32
    %c0_i32_0 = arith.constant 0 : i32
    %c0_i32_1 = arith.constant 0 : i32
    return %c0_i32, %c0_i32_0 : i32, i32
  }
  func.func @transform_12(%arg0: i32) -> (i32, i32) {
    %c0_i32 = arith.constant 0 : i32
    %c0_i32_0 = arith.constant 0 : i32
    %c0_i32_1 = arith.constant 0 : i32
    return %c0_i32, %c0_i32_0 : i32, i32
  }
  func.func @transform_13(%arg0: i32) -> (i32, i32) {
    %c0_i32 = arith.constant 0 : i32
    %c0_i32_0 = arith.constant 0 : i32
    return %arg0, %c0_i32 : i32, i32
  }
}

</mosaic_0001>

<bundles_post_ra>
// kernel: tpu_custom_call.1
= control target key start
LH: loop header
LB: loop body
LE: loop exit
PB: predicated region body
PF: predicated region fallthrough
CT: control target
= control target key end

     0   :  { %s1801_s0 = inlined_call_operand.<no memory space> [shape: f32[1], index: 0, kind: input, shape index: {}]   ;;  %s1802_s1 = inlined_call_operand.<no memory space> [shape: s32[1], index: 1, kind: input, shape index: {}]   ;;  %s1803_s2 = inlined_call_operand.vmem [shape: f32[32,32], index: 2, kind: input, shape index: {}]   ;;  %s1804_s3 = inlined_call_operand.vmem [shape: f32[32,3], index: 3, kind: input, shape index: {}]   ;;  %s1805_s4 = inlined_call_operand.hbm [shape: f32[3,32], index: 4, kind: input, shape index: {}]   ;;  %s1806_s5 = inlined_call_operand.hbm [shape: f32[32,32], index: 5, kind: input, shape index: {}]   ;;  %s1807_s6 = inlined_call_operand.hbm [shape: f32[32,32], index: 6, kind: input, shape index: {}]   ;;  %s1808_s7 = inlined_call_operand.hbm [shape: f32[32,32], index: 7, kind: input, shape index: {}]   ;;  %s1809_s8 = inlined_call_operand.vmem [shape: f32[32,32], index: 8, kind: input, shape index: {}]   ;;  %s1810_s9 = inlined_call_operand.vmem [shape: f32[1,32], index: 9, kind: input, shape index: {}]   ;;  %s1811_s10 = inlined_call_operand.vmem [shape: f32[1,32], index: 10, kind: input, shape index: {}]   ;;  %s1812_s11 = inlined_call_operand.vmem [shape: f32[1,32], index: 11, kind: input, shape index: {}]   ;;  %s1813_s12 = inlined_call_operand.vmem [shape: f32[1,32], index: 12, kind: input, shape index: {}]   ;;  %s1814_s13 = inlined_call_operand.hbm [shape: f32[32,32], index: 13, kind: output, shape index: {}]  }
   0x1   :  { %1825 = sst [smem:[#allocation23_spill]] %s1814_s13 }
   0x2   :  { %18 = sst [smem:[#allocation2]] %s1801_s0 }
   0x3   :  { %19 = sst [smem:[#allocation3]] %s1802_s1 }
   0x4   :  { %20 = vsyncpa [#allocation5], 0 }
   0x5   :  { %21 = vsyncpa [#allocation8], 0 }
   0x6   :  { %22 = vsyncpa [#allocation11], 0 }
   0x7   :  { %23 = vsyncpa [#allocation6], 0 }
   0x8   :  { %25 = vsyncpa [#allocation6 + $0x1], 0  ;;  %s1519_s29 = smov 0   ;;  %s1521_s30 = smov 0  }
   0x9   :  { %s1523_s14 = smov 0   ;;  %s1525_s15 = smov 0  }
   0xa LB: > { %1826 = sst [smem:[#allocation17_spill]] %s1416_s29  ;;  %s1540_s0 = sadd.s32 4294967295, %s1428_s15   ;;  %s1428_s15 = sphi %s1525_s15, %s1850_s15   ;;  %s1424_s14 = sphi %s1523_s14, %s1852_s14   ;;  %s1420_s30 = sphi %s1521_s30, %s1854_s30   ;;  %s1416_s29 = sphi %s1519_s29, %s1853_s29  }
   0xb   : > { %1827 = sst [smem:[#allocation18_spill]] %s1424_s14  ;;  %s1030_s1 = sadd.s32 4294967294, %s1428_s15  }
   0xc   : > { %1828 = sst [smem:[#allocation19_spill]] %s1428_s15  ;;  %s1544_s16 = sadd.s32 1, %s1428_s15  }
   0xd   : > { %1829 = sst [smem:[#allocation20_spill]] %s1544_s16  ;;  %s321_s17 = sadd.s32 1, %s1424_s14 }
   0xe   : > { %s318_s18 = ssub.s32 %s1428_s15, %s1544_s16  ;;  %p331_p0 = scmp.ne.s32.totalorder %s1424_s14, %s1420_s30 }
   0xf   : > { %p319_p1 = scmp.eq.s32.totalorder %s318_s18, 0  ;;  %p332_p2 = scmp.eq.s32.totalorder %s1540_s0, 3 }
  0x10   : > { %p337_p3 = scmp.ne.s32.totalorder %s1420_s30, %s1416_s29  ;;  %p338_p4 = scmp.eq.s32.totalorder %s1030_s1, 3 }
  0x11   : > { %s1555_s19 = scalar_select %p319_p1, %s1424_s14, %s321_s17  }
  0x12   : > { %p1557_p5 = por %p332_p2, %p331_p0  ;;  %p1561_p6 = por %p338_p4, %p337_p3 }
  0x13   : > { %1830 = sst [smem:[#allocation21_spill]] %s1555_s19  ;;  %p1031_p7 = scmp.ge.s32.totalorder %s1428_s15, 1 }
  0x14   : > { %s1831_s20 = scalar_select %p1557_p5, 1, 0 }
  0x15   : > { %s1832_s21 = scalar_select %p1561_p6, 1, 0 }
  0x16   : > { %p345_p8 = scmp.lt.s32.totalorder %s1428_s15, 5  ;;  %p1818_p9 = scmp.eq.s32.totalorder %s1540_s0, 0 }
  0x17   : > { %1833 = sst [smem:[#allocation22_spill]] %s1832_s21  ;;  %s1430_s23 = smov [#allocation7]  }
  0x18   : > { %p1568_p10 = pnand %p1031_p7, %p345_p8  ;;  %s374_s24 = sshll.u32 %s1430_s23, 4  ;;  %s1574_s24 = int_to_ptr.vmem [resolvable:$true] %s374_s24 }
  0x19   : > { %s1431_s26 = smov [#allocation4]   ;;  %s1432_s28 = smov [#allocation9]  }
  0x1a   : > { %s1834_s22 = scalar_select %p1568_p10, 1, 0 }
  0x1b   : > { %p1168_p11 = pneg %p1568_p10  ;;  %s364_s27 = sshll.u32 %s1431_s26, 4  ;;  %s1582_s27 = int_to_ptr.vmem [resolvable:$true] %s364_s27 }
  0x1c   : > { %s1584_s1 = sshll.u32 %s1432_s28, 4  ;;  %s1242_s23 = scalar_lea.hbm %s1806_s5, 512  ;;  %s388_s1 = int_to_ptr.vmem [resolvable:$true] %s1584_s1 }
  0x1d   : > { %p1578_p12 = pnand %p1818_p9, %p1168_p11  ;;  %p1243_p13 = scmp.ne.s32.totalorder %s1806_s5, %s1242_s23 }
  0x1e   : > { %p1249_p3 = scmp.lt.u32.totalorder %s1242_s23, %s1806_s5 }
  0x1f   : > { %p1594_p0 = pneg %p1578_p12 }
  0x21   : > { %p1245_p1 = pnand %p1594_p0, %p1243_p13 }
  0x23   : > { %p1246_p2 = pneg %p1245_p1 }
  0x25   : > { %p1251_p4 = pnand %p1249_p3, %p1246_p2 }
  0x27   : > { %1254 = shalt.err (!%p1251_p4)
}
  0x28   : > { %s1255_s14 = scalar_lea.vmem %s1574_s24, 512  ;;  %p1263_p9 = scmp.lt.s32.totalorder %s1574_s24, %s1574_s24 }
  0x29   : > { %p1256_p7 = scmp.ne.s32.totalorder %s1574_s24, %s1255_s14  ;;  %p1264_p6 = scmp.lt.s32.totalorder %s1255_s14, %s1255_s14 }
  0x2b   : > { %p1258_p8 = pnand %p1256_p7, %p1594_p0  ;;  %p1265_p13 = por %p1264_p6, %p1263_p9 }
  0x2d   : > { %p1259_p11 = pneg %p1258_p8 }
  0x2f   : > { %p1266_p1 = pnand %p1265_p13, %p1259_p11 }
  0x31   : > { %1269 = shalt.err (!%p1266_p1)
}
  0x32   : > { %s1433_s19 = smov 128   ;;  %s1434_s17 = smov 8  }
  0x33   : > { %1174 = dma.hbm_to_vmem [thread:$0]  (!%p1578_p12), %s1806_s5, 512, %s1574_s24, [#allocation8], %s1433_s19, %s1433_s19, %s1434_s17  }
  0x34   : > { %s1270_s14 = scalar_lea.hbm %s1805_s4, 64 }
  0x35   : > { %p1271_p6 = scmp.ne.s32.totalorder %s1805_s4, %s1270_s14  ;;  %p1277_p3 = scmp.lt.u32.totalorder %s1270_s14, %s1805_s4 }
  0x37   : > { %p1273_p9 = pnand %p1271_p6, %p1594_p0 }
  0x39   : > { %p1274_p2 = pneg %p1273_p9 }
  0x3b   : > { %p1279_p4 = pnand %p1277_p3, %p1274_p2 }
  0x3d   : > { %1282 = shalt.err (!%p1279_p4)
}
  0x3e   : > { %s1283_s24 = scalar_lea.vmem %s1582_s27, 64  ;;  %p1291_p13 = scmp.lt.s32.totalorder %s1582_s27, %s1582_s27 }
  0x3f   : > { %p1284_p7 = scmp.ne.s32.totalorder %s1582_s27, %s1283_s24  ;;  %p1292_p1 = scmp.lt.s32.totalorder %s1283_s24, %s1283_s24 }
  0x41   : > { %p1286_p8 = pnand %p1284_p7, %p1594_p0  ;;  %p1293_p6 = por %p1292_p1, %p1291_p13 }
  0x43   : > { %p1287_p11 = pneg %p1286_p8 }
  0x45   : > { %p1294_p9 = pnand %p1293_p6, %p1287_p11 }
  0x47   : > { %1297 = shalt.err (!%p1294_p9)
}
  0x48   : > { %1171 = dma.hbm_to_vmem [thread:$0]  (!%p1578_p12), %s1805_s4, 64, %s1582_s27, [#allocation5]  }
  0x49   : > { %s1298_s18 = scalar_lea.hbm %s1807_s6, 512 }
  0x4a   : > { %p1299_p2 = scmp.ne.s32.totalorder %s1807_s6, %s1298_s18  ;;  %p1305_p7 = scmp.lt.u32.totalorder %s1298_s18, %s1807_s6 }
  0x4c   : > { %p1301_p3 = pnand %p1299_p2, %p1594_p0 }
  0x4e   : > { %p1302_p4 = pneg %p1301_p3 }
  0x50   : > { %p1307_p8 = pnand %p1305_p7, %p1302_p4 }
  0x52   : > { %1310 = shalt.err (!%p1307_p8)
}
  0x53   : > { %s1311_s24 = scalar_lea.vmem %s388_s1, 512  ;;  %p1319_p6 = scmp.lt.s32.totalorder %s388_s1, %s388_s1 }
  0x54   : > { %p1312_p11 = scmp.ne.s32.totalorder %s388_s1, %s1311_s24  ;;  %p1320_p9 = scmp.lt.s32.totalorder %s1311_s24, %s1311_s24 }
  0x56   : > { %p1314_p13 = pnand %p1312_p11, %p1594_p0  ;;  %p1321_p5 = por %p1320_p9, %p1319_p6 }
  0x58   : > { %p1315_p1 = pneg %p1314_p13 }
  0x5a   : > { %p1322_p10 = pnand %p1321_p5, %p1315_p1 }
  0x5c   : > { %1325 = shalt.err (!%p1322_p10)
}
  0x5d   : > { %1177 = dma.hbm_to_vmem [thread:$0]  (!%p1578_p12), %s1807_s6, 512, %s388_s1, [#allocation8], %s1433_s19, %s1433_s19, %s1434_s17  }
  0x5e   : > { %s1435_s29 = smov [#allocation10]   ;;  %s1326_s23 = scalar_lea.hbm %s1808_s7, 512 }
  0x5f   : > { %s400_s15 = sshll.u32 %s1435_s29, 4  ;;  %p1327_p5 = scmp.ne.s32.totalorder %s1808_s7, %s1326_s23  ;;  %s401_s15 = int_to_ptr.vmem [resolvable:$true] %s400_s15 }
  0x60   : > { %p1333_p3 = scmp.lt.u32.totalorder %s1326_s23, %s1808_s7 }
  0x61   : > { %p1329_p10 = pnand %p1327_p5, %p1594_p0 }
  0x63   : > { %p1330_p2 = pneg %p1329_p10 }
  0x65   : > { %p1335_p4 = pnand %p1333_p3, %p1330_p2 }
  0x67   : > { %1338 = shalt.err (!%p1335_p4)
}
  0x68   : > { %s1339_s1 = scalar_lea.vmem %s401_s15, 512  ;;  %p1347_p13 = scmp.lt.s32.totalorder %s401_s15, %s401_s15 }
  0x69   : > { %p1340_p7 = scmp.ne.s32.totalorder %s401_s15, %s1339_s1  ;;  %p1348_p1 = scmp.lt.s32.totalorder %s1339_s1, %s1339_s1 }
  0x6b   : > { %p1342_p8 = pnand %p1340_p7, %p1594_p0  ;;  %p1349_p6 = por %p1348_p1, %p1347_p13 }
  0x6d   : > { %p1343_p11 = pneg %p1342_p8 }
  0x6f   : > { %p1350_p9 = pnand %p1349_p6, %p1343_p11 }
  0x71   : > { %1353 = shalt.err (!%p1350_p9)
}
  0x72   : > { %1180 = dma.hbm_to_vmem [thread:$0]  (!%p1578_p12), %s1808_s7, 512, %s401_s15, [#allocation11], %s1433_s19, %s1433_s19, %s1434_s17  }
  0x73   : > { %p1837_p5 = scmp.ne.s32.totalorder %s1834_s22, 0 }
  0x74   : > { %p1838_p0 = scmp.eq.s32.totalorder (!%p1837_p5), %s1540_s0, 0 }
  0x75   : > { %445 = sbr.rel (%p1837_p5) target bundleno = 1053 (0x41d), region = 72 }
  0x7c   : > { %1399 = dma.done.wait (%p1838_p0), [#allocation5], 64   ;;  %p1839_p10 = pmov %p1838_p0 }
  0x7d   : > { %p1840_p2 = pmov %p1838_p0 }
  0x7e   : > { %1401 = vsyncadd (%p1839_p10), [#allocation5], 4294967232 }
  0x7f   : > { %1403 = dma.done.wait (%p1840_p2), [#allocation8], 1024   ;;  %p1841_p3 = pmov %p1838_p0 }
  0x80   : > { %p1842_p4 = pmov %p1838_p0 }
  0x81   : > { %1405 = vsyncadd (%p1841_p3), [#allocation8], 4294966272 }
  0x82   : > { %1407 = dma.done.wait (%p1842_p4), [#allocation11], 512   ;;  %p1843_p12 = pmov %p1838_p0 }
  0x83   : > { %s501_s16 = sand.u32 1, %s1420_s30   ;;  %p504_p7 = scmp.lt.s32.totalorder %s1540_s0, 3 }
  0x84   : > { %1409 = vsyncadd (%p1843_p12), [#allocation11], 4294966784  ;;  %s512_s22 = sld [smem:[#allocation3]]  ;;  %s1042_s25 = sshll.u32 %s501_s16, 3 }
  0x85   : > { %s505_s19 = scalar_select %p504_p7, %s1540_s0, 3 }
  0x86   : > { %s1711_s28 = scalar_lea.vmem [#allocation12], %s1042_s25 }
  0x87   : > { %s1043_s17 = sshll.u32 %s505_s19, 3 }
  0x88   : > { %s1706_s21 = scalar_lea.vmem %s1803_s2, %s1043_s17  ;;  %s511_s26 = scalar_lea.vmem %s1804_s3, %s1043_s17 }
  0x8a   : > { %p1045_p8 = scmp.eq.s32.totalorder %s512_s22, 0 }
  0x8b   : > { %v517_v0 = vld [vmem:[%s1706_s21] sm:$0xff] (!%p1045_p8)  ;;  %vm518_vm0 = vcmask (!%p1045_p8), 261120  }
  0x8c   : > { %516 = sbr.rel (%p1045_p8) target bundleno = 147 (0x93), region = 92  ;;  %519 = vst.msk [vmem:[%s1711_s28] sm:$0xff] (!%p1045_p8), %vm518_vm0, %v517_v0 }
  0x93 PF: > { %p1046_p11 = scmp.ne.s32.totalorder %s512_s22, 0 }
  0x94   : > { %v527_v1 = vld [vmem:[#allocation7] sm:$0xff] (!%p1046_p11)  ;;  %v528_v2 = vld [vmem:[#allocation7 + $0x8] sm:$0xff] (!%p1046_p11)  ;;  %v529_v3 = vld [vmem:[#allocation7 + $0x10] sm:$0xff] (!%p1046_p11)  ;;  %v1436_v4 = vmov (!%p1046_p11), 0.0|0.0   ;;  %vm1437_vm1 = vmmov (!%p1046_p11), 0   ;;  %v1438_v7 = vmov (!%p1046_p11), 0.0  }
  0x95   : > { %523 = sbr.rel (%p1046_p11) target bundleno = 1027 (0x403), region = 96  ;;  %1126 = vmatprep.subr.bf16.mxu0 (!%p1046_p11), %v1436_v4  ;;  %v1127_v5 = vpack.c.bf16 (!%p1046_p11), %v528_v2, %v527_v1  ;;  %v530_v6 = vld [vmem:[#allocation7 + $0x18] sm:$0xff] (!%p1046_p11)  ;;  %1090 = vmatprep.mubr.msk.f32.mxu0 (!%p1046_p11), %vm1437_vm1, %v1438_v7  ;;  %v1439_v8 = vmov (!%p1046_p11), 0   ;;  %s526_s14 = sld [smem:[#allocation2]] (!%p1046_p11)  ;;  %v1440_v10 = vmov (!%p1046_p11), 2   ;;  %vm538_vm2 = vcmask (!%p1046_p11), 261120  }
  0x96   : > { %1238 = vset.pattern.permute.xlu0 (!%p1046_p11), %v1439_v8  ;;  %1132 = vmatprep.subr.bf16.mxu1 (!%p1046_p11), %v1436_v4  ;;  %v1130_v9 = vpack.c.bf16 (!%p1046_p11), %v530_v6, %v529_v3  ;;  %v525_v11 = vld [vmem:[%s511_s26] sm:$0xff] (!%p1046_p11)  ;;  %v1441_v15 = vmov (!%p1046_p11), 1   ;;  %v650_v17 = vld [vmem:[#allocation9 + $0x8] sm:$0xff] (!%p1046_p11)  ;;  %v651_v19 = vld [vmem:[#allocation9 + $0x10] sm:$0xff] (!%p1046_p11) }
  0x97   : > { %1128 = vmatpush3.bf16.msra.mxu0 (!%p1046_p11), %v1127_v5  ;;  %1240 = vset.pattern.permute.xlu1 (!%p1046_p11), %v1440_v10  ;;  %v524_v12 = vld [vmem:[%s1706_s21] sm:$0xff] (!%p1046_p11)  ;;  %v735_v23 = vld [vmem:[#allocation10 + $0x8] sm:$0xff] (!%p1046_p11)  ;;  %v736_v42 = vld [vmem:[#allocation10 + $0x10] sm:$0xff] (!%p1046_p11) }
  0x98   : > { %1129 = vmatprep.subr.bf16.mxu0 (!%p1046_p11), %v1436_v4  ;;  %1101 = vmatprep.mubr.msk.f32.mxu1 (!%p1046_p11), %vm1437_vm1, %v1438_v7  ;;  %v649_v16 = vld [vmem:[#allocation9] sm:$0xff] (!%p1046_p11)  ;;  %v652_v20 = vld [vmem:[#allocation9 + $0x18] sm:$0xff] (!%p1046_p11)  ;;  %v821_v53 = vld [vmem:[%s1809_s8 + $0x10] sm:$0xff] (!%p1046_p11) }
  0x99   : > { %v1133_v18 = vpack.c.bf16 (!%p1046_p11), %v650_v17, %v649_v16  ;;  %v1136_v21 = vpack.c.bf16 (!%p1046_p11), %v652_v20, %v651_v19  ;;  %v734_v22 = vld [vmem:[#allocation10] sm:$0xff] (!%p1046_p11)  ;;  %v1049_v26 = vld [vmem:[#allocation4] ss:$0 sm:$0xff] (!%p1046_p11)  ;;  %v1050_v28 = vld [vmem:[#allocation4 + $0x1] ss:$0 sm:$0xff] (!%p1046_p11) }
  0x9a   : > { %v1139_v24 = vpack.c.bf16 (!%p1046_p11), %v735_v23, %v734_v22  ;;  %v1047_v27 = vld [vmem:[%s1810_s9] ss:$0 sm:$0xff] (!%p1046_p11)  ;;  %v1051_v31 = vld [vmem:[#allocation4 + $0x2] ss:$0 sm:$0xff] (!%p1046_p11)  ;;  %v820_v46 = vld [vmem:[%s1809_s8 + $0x8] sm:$0xff] (!%p1046_p11) }
  0x9b   : > { %1131 = vmatpush3.bf16.msra.mxu0 (!%p1046_p11), %v1130_v9  ;;  %v612_v13 = vstv (!%p1046_p11), %s526_s14  ;;  %1134 = vmatpush3.bf16.msra.mxu1 (!%p1046_p11), %v1133_v18  ;;  %v737_v43 = vld [vmem:[#allocation10 + $0x18] sm:$0xff] (!%p1046_p11) }
  0x9c   : > { %1138 = vmatprep.subr.bf16.mxu0 %v1436_v4  ;;  %v613_v14 = vmul.f32 %v612_v13, %v525_v11  ;;  %1135 = vmatprep.subr.bf16.mxu1 %v1436_v4  ;;  %v1142_v44 = vpack.c.bf16 %v737_v43, %v736_v42  ;;  %v819_v45 = vld [vmem:[%s1809_s8] sm:$0xff]  ;;  %v822_v54 = vld [vmem:[%s1809_s8 + $0x18] sm:$0xff] }
  0x9d   : > { %v1145_v47 = vpack.c.bf16 %v820_v46, %v819_v45  ;;  %v1052_v48 = vld [vmem:[%s1811_s10] ss:$0 sm:$0xff]  ;;  %v1148_v55 = vpack.c.bf16 %v822_v54, %v821_v53 }
  0x9e   : > { %1091 = vmatmul.mubr.msk.f32.vlgmr.msra.gmra.mrb[0].mxu0 %vm538_vm2, %v524_v12  ;;  %617 = vperm.xlu0 %1238, %v613_v14   ;;  %v1054_v56 = vld [vmem:[%s1812_s11] ss:$0 sm:$0xff] }
  0x9f   : > { %639 = vperm.xlu1 %1240, %v613_v14   ;;  %1112 = vmatprep.mubr.msk.f32.mxu0 %vm1437_vm1, %v1438_v7  ;;  %v1056_v61 = vld [vmem:[%s1813_s12] ss:$0 sm:$0xff] }
  0xa0   : > { %1137 = vmatpush3.bf16.msra.mxu1 %v1136_v21  ;;  %1140 = vmatpush3.bf16.msra.mxu0 %v1139_v24 }
  0xa1   : > { %1144 = vmatprep.subr.bf16.mxu1 %v1436_v4  ;;  %1141 = vmatprep.subr.bf16.mxu0 %v1436_v4 }
  0xa2   : > { %1239 = vset.pattern.permute.xlu0 %v1441_v15 }
  0xa3   : > { %628 = vperm.xlu0 %1239, %v613_v14  }
  0xa4   : > { %1143 = vmatpush3.bf16.msra.mxu0 %v1142_v44 }
  0xa7   : > { %1241 = vset.pattern.permute.xlu0 %v1440_v10 }
 0x11d   : > { %v618_v25 = vpop.permute.xlu0 %617 }
 0x11e   : > { %v640_v32 = vpop.permute.xlu1 %639  ;;  %v624_v33 = vmul.f32 %v1049_v26, %v618_v25 }
 0x11f   : > { %v646_v38 = vmul.f32 %v1051_v31, %v640_v32 }
 0x122   : > { %v629_v29 = vpop.permute.xlu0 %628 }
 0x123   : > { %v635_v36 = vmul.f32 %v1050_v28, %v629_v29 }
 0x171   : > { %v608_v30 = vpop.f32.mrb[0].mxu0 }
 0x172   : > { %v609_v34 = vadd.f32 %v1047_v27, %v608_v30  ;;  %v1092_v35 = vpop.f32.mrb[1].mxu0 }
 0x174   : > { %v625_v37 = vadd.f32 %v624_v33, %v609_v34 }
 0x176   : > { %v636_v39 = vadd.f32 %v635_v36, %v625_v37 }
 0x178   : > { %v647_v40 = vadd.f32 %v646_v38, %v636_v39 }
 0x17a   : > { %v648_v41 = vmax.f32 %v647_v40, 0.0 }
 0x17c   : > { %1102 = vmatmul.mubr.msk.f32.vlgmr.msra.gmra.mrb[0].mxu1 %vm538_vm2, %v648_v41 }
 0x17d   : > { %1123 = vmatprep.mubr.msk.f32.mxu1 %vm1437_vm1, %v1438_v7  ;;  %1146 = vmatpush3.bf16.msra.mxu1 %v1145_v47 }
 0x17e   : > { %1147 = vmatprep.subr.bf16.mxu1 %v1436_v4 }
 0x181   : > { %1149 = vmatpush3.bf16.msra.mxu1 %v1148_v55 }
 0x24f   : > { %v729_v49 = vpop.f32.mrb[0].mxu1 }
 0x250   : > { %v730_v50 = vadd.f32 %v1052_v48, %v729_v49  ;;  %v1103_v51 = vpop.f32.mrb[1].mxu1 }
 0x252   : > { %v733_v52 = vmax.f32 %v730_v50, 0.0 }
 0x254   : > { %1113 = vmatmul.mubr.msk.f32.vlgmr.msra.gmra.mrb[2].mxu0 %vm538_vm2, %v733_v52 }
 0x327   : > { %v814_v57 = vpop.f32.mrb[2].mxu0 }
 0x328   : > { %v815_v58 = vadd.f32 %v1054_v56, %v814_v57  ;;  %v1114_v59 = vpop.f32.mrb[3].mxu0 }
 0x32a   : > { %v818_v60 = vmax.f32 %v815_v58, 0.0 }
 0x32c   : > { %1124 = vmatmul.mubr.msk.f32.vlgmr.msra.gmra.mrb[2].mxu1 %vm538_vm2, %v818_v60 }
 0x3ff   : > { %v899_v62 = vpop.f32.mrb[2].mxu1 }
 0x400   : > { %v900_v63 = vadd.f32 %v1056_v61, %v899_v62  ;;  %v1125_v0 = vpop.f32.mrb[3].mxu1 }
 0x402   : > { %903 = vst.msk [vmem:[%s1711_s28] sm:$0xff] %vm538_vm2, %v900_v63 }
 0x403 PF: > { %s1059_s1 = sshll.u32 %s1540_s0, 7  ;;  %s1844_s22 = sld [smem:[#allocation23_spill]] }
 0x404   : > { %s918_s19 = sshll.u32 %s1711_s28, 4  ;;  %s905_s17 = scalar_lea.sflag [#allocation6], %s501_s16  ;;  %s919_s19 = int_to_ptr.vmem [resolvable:$true] %s918_s19 }
 0x405   : > { %s1354_s29 = scalar_lea.vmem %s919_s19, 128  ;;  %p1845_p1 = scmp.ne.s32.totalorder %s1831_s20, 0 }
 0x406   : > { %p1355_p13 = scmp.ne.s32.totalorder %s919_s19, %s1354_s29  ;;  %s1442_s15 = smov [#allocation12]  }
 0x407   : > { %s1358_s21 = sshll.u32 %s1442_s15, 4  ;;  %s1359_s21 = int_to_ptr.vmem [resolvable:$false] %s1358_s21 }
 0x408   : > { %p1356_p6 = pnand %p1355_p13, %p1845_p1  ;;  %s1360_s18 = scalar_lea.vmem %s1359_s21, 256 }
 0x409   : > { %s1762_s25 = scalar_lea.hbm %s1844_s22, %s1059_s1  ;;  %p1361_p5 = scmp.lt.s32.totalorder %s919_s19, %s1359_s21 }
 0x40a   : > { %p1357_p9 = pneg %p1356_p6  ;;  %p1362_p0 = scmp.lt.s32.totalorder %s1360_s18, %s1354_s29 }
 0x40c   : > { %p1363_p10 = por %p1362_p0, %p1361_p5 }
 0x40e   : > { %p1364_p2 = pnand %p1363_p10, %p1357_p9 }
 0x410   : > { %1367 = shalt.err (!%p1364_p2)
}
 0x411   : > { %s1368_s0 = scalar_lea.hbm %s1762_s25, 128  ;;  %s1372_s23 = scalar_lea.hbm %s1844_s22, 512 }
 0x412   : > { %p1369_p3 = scmp.ne.s32.totalorder %s1762_s25, %s1368_s0  ;;  %p1373_p7 = scmp.lt.u32.totalorder %s1762_s25, %s1844_s22 }
 0x413   : > { %p1374_p8 = scmp.lt.u32.totalorder %s1372_s23, %s1368_s0  ;;  %p1376_p13 = scmp.lt.u32.totalorder %s1368_s0, %s1762_s25 }
 0x414   : > { %p1370_p4 = pnand %p1369_p3, %p1845_p1 }
 0x415   : > { %p1375_p11 = por %p1374_p8, %p1373_p7 }
 0x416   : > { %p1371_p12 = pneg %p1370_p4 }
 0x417   : > { %p1377_p6 = por %p1376_p13, %p1375_p11 }
 0x419   : > { %p1378_p9 = pnand %p1377_p6, %p1371_p12 }
 0x41b   : > { %1381 = shalt.err (!%p1378_p9)
}
 0x41c   : > { %1166 = dma.vmem_to_hbm [thread:$0]  (%p1845_p1), %s919_s19, 128, %s1762_s25, %s905_s17  }
 0x41d PF: > { %s1846_s24 = sld [smem:[#allocation19_spill]]  ;;  %s1847_s1 = sld [smem:[#allocation17_spill]] }
 0x41e   : > { %s1848_s27 = sld [smem:[#allocation22_spill]] }
 0x423   : > { %p1193_p5 = scmp.ge.s32.totalorder %s1846_s24, 2  ;;  %s930_s13 = sand.u32 1, %s1847_s1  }
 0x424   : > { %p1849_p0 = scmp.ne.s32.totalorder %s1848_s27, 0  ;;  %s931_s29 = scalar_lea.sflag [#allocation6], %s930_s13 }
 0x426   : > { %p1182_p10 = pnand %p1193_p5, %p1849_p0 }
 0x428   : > { %1411 = dma.done.wait (!%p1182_p10), %s931_s29, 128  }
 0x429   : > { %1413 = vsyncadd (!%p1182_p10), %s931_s29, 4294967168  ;;  %s1850_s15 = sld [smem:[#allocation20_spill]]  ;;  %s1851_s21 = sld [smem:[#allocation18_spill]] }
 0x42a   : > { %s1852_s14 = sld [smem:[#allocation21_spill]]  ;;  %s1853_s29 = smov %s1420_s30 }
 0x42f   : > { %p28_p2 = scmp.ge.s32.totalorder %s1850_s15, 6   ;;  %s1854_s30 = smov %s1851_s21 }
 0x431   :  { %30 = sbr.rel (!%p28_p2) target bundleno = 10 (0xa), region = 135 }
 0x438   :  { %936 = vsyncpa [#allocation5], 1 }
 0x439   :  { %938 = vsyncpa [#allocation5 + $0x1], 1 }
 0x43a   :  { %939 = vsyncpa [#allocation8], 1 }
 0x43b   :  { %940 = vsyncpa [#allocation11], 1 }
 0x43c   :  { %941 = vsyncpa [#allocation6], 1 }
 0x43d   :  { %943 = vsyncpa [#allocation6 + $0x1], 1 }

</bundles_post_ra>
